<compile_context>
chip_gen: v5e
topology: v5e:2x2
jax: 0.10.0
libtpu: 0.0.40
codegen_flags: <defaults>
</compile_context>

<pallas_src>
import math

import jax
import jax.numpy as jnp
from jax.experimental import pallas as pl
from jax.experimental.pallas import tpu as pltpu

_LANES = 128            # vreg lane width: lane-dense layout -> full, unmasked vst
_MAX_TILE_ROWS = 4096   # 4096 x 128 x 4B = 2 MiB f32 tile; 2 bufs x (in+out) = 8 MiB
                        # -> fits v5e's 16 MiB scoped-VMEM default and v7x's 32 MiB.


def _copy_kernel(x_ref, o_ref):
    # Pure pass-through: one full-tile vector load + store per grid step.
    o_ref[...] = x_ref[...]


def network_architecture_forward(x):
    """Forward of the abstract NetworkArchitecture base class.

    It defines no parameters and no transform, so the semantics are the
    identity; per the performance review the fastest implementation is to
    return x with zero HBM traffic.
    """
    return x


@jax.jit
def network_architecture_forward_pallas(x):
    """Identity forward realized as a lane-dense, tiled, pipelined Pallas copy."""
    orig_shape = x.shape
    total = math.prod(orig_shape) if orig_shape else 1
    if total == 0:
        return x  # nothing to copy for an empty tensor

    itemsize = jnp.dtype(x.dtype).itemsize
    sublane_mult = max(8, 32 // itemsize)   # f32: 8, bf16: 16, int8: 32
    flat = x.reshape(-1)                     # contiguous row-major: layout-free reshape

    if total % _LANES == 0 and (total // _LANES) % sublane_mult == 0:
        # ---- lane-dense tiled path: (rows, 128), no padding, no post-slice ----
        rows = total // _LANES
        x2d = flat.reshape(rows, _LANES)
        tile_rows = min(_MAX_TILE_ROWS, rows)          # multiple of sublane_mult
        grid = (pl.cdiv(rows, tile_rows),)             # ragged last block is masked by Pallas

        out2d = pl.pallas_call(
            _copy_kernel,
            out_shape=jax.ShapeDtypeStruct((rows, _LANES), x.dtype),
            grid_spec=pltpu.PrefetchScalarGridSpec(
                num_scalar_prefetch=0,
                grid=grid,
                in_specs=[pl.BlockSpec((tile_rows, _LANES), lambda i: (i, 0))],
                out_specs=pl.BlockSpec((tile_rows, _LANES), lambda i: (i, 0)),
            ),
            compiler_params=pltpu.CompilerParams(
                # Independent tiles: shard the grid loop across TensorCores on
                # v7x (2 TCs); measured no-op on single-TC v5e/v6e.
                dimension_semantics=("parallel",),
            ),
        )(x2d)
        return out2d.reshape(orig_shape)

    # ---- ragged fallback: one full-dims block (allowed regardless of (8,128)),
    # still no padding and no post-slice. Sized for the small inputs this
    # abstract base class would ever see.
    x2d = flat.reshape(1, total)
    out2d = pl.pallas_call(
        _copy_kernel,
        out_shape=jax.ShapeDtypeStruct((1, total), x.dtype),
        grid_spec=pltpu.PrefetchScalarGridSpec(
            num_scalar_prefetch=0,
            grid=(1,),
            in_specs=[pl.BlockSpec((1, total), lambda i: (0, 0))],
            out_specs=pl.BlockSpec((1, total), lambda i: (0, 0)),
        ),
    )(x2d)
    return out2d.reshape(orig_shape)


if __name__ == "__main__":
    key = jax.random.PRNGKey(0)
    # Small NCHW-like input consistent with what a concrete subclass would see.
    x = jax.random.normal(key, (2, 4, 16, 16), dtype=jnp.float32)

    # Production path: identity, zero HBM traffic.
    y_fast = network_architecture_forward(x)

    # Pallas path: optimized identity copy kernel.
    y_pallas = jax.block_until_ready(network_architecture_forward_pallas(x))

    assert y_fast.shape == x.shape and y_fast.dtype == x.dtype
    assert y_pallas.shape == x.shape and y_pallas.dtype == x.dtype
    assert bool(jnp.all(y_fast == x))
    assert bool(jnp.all(y_pallas == x))

    print("KERNEL_OK")
</pallas_src>

<mosaic_0001>
module attributes {stable_mosaic.version = 11 : i64} {
  func.func @_copy_kernel(%arg0: i32, %arg1: memref<16x128xf32, #tpu.memory_space<vmem>>, %arg2: memref<16x128xf32, #tpu.memory_space<vmem>>) attributes {dimension_semantics = [#tpu.dimension_semantics<parallel>], iteration_bounds = array<i64: 1>, scalar_prefetch = 0 : i64, scratch_operands = 0 : i64, tpu.core_type = #tpu.core_type<tc>, window_params = [{transform_indices = @transform_0, window_bounds = array<i64: 16, 128>}, {transform_indices = @transform_1, window_bounds = array<i64: 16, 128>}]} {
    %c0 = arith.constant 0 : index
    %c0_0 = arith.constant 0 : index
    %0 = vector.load %arg1[%c0, %c0_0] : memref<16x128xf32, #tpu.memory_space<vmem>>, vector<16x128xf32>
    %c0_1 = arith.constant 0 : index
    %c0_2 = arith.constant 0 : index
    %1 = vector.load %arg2[%c0_1, %c0_2] : memref<16x128xf32, #tpu.memory_space<vmem>>, vector<16x128xf32>
    tpu.vector_store %arg2[%c0_1, %c0_2], %0 {strides = array<i32>} : memref<16x128xf32, #tpu.memory_space<vmem>>, vector<16x128xf32>,
    return
  }
  func.func @transform_0(%arg0: i32) -> (i32, i32) {
    %c0_i32 = arith.constant 0 : i32
    %c0_i32_0 = arith.constant 0 : i32
    return %arg0, %c0_i32 : i32, i32
  }
  func.func @transform_1(%arg0: i32) -> (i32, i32) {
    %c0_i32 = arith.constant 0 : i32
    %c0_i32_0 = arith.constant 0 : i32
    return %arg0, %c0_i32 : i32, i32
  }
}

</mosaic_0001>

<bundles_post_ra>
// kernel: network_architecture_forward_pallas.1
= control target key start
LH: loop header
LB: loop body
LE: loop exit
PB: predicated region body
PF: predicated region fallthrough
CT: control target
= control target key end

     0   :  { %s38_s0 = inlined_call_operand.vmem [shape: f32[16,128], index: 0, kind: input, shape index: {}]   ;;  %s39_s1 = inlined_call_operand.vmem [shape: f32[16,128], index: 1, kind: output, shape index: {}]  }
   0x1   :  { %v8_v0 = vld [vmem:[%s38_s0] sm:$0xff]  ;;  %v9_v1 = vld [vmem:[%s38_s0 + $0x8] sm:$0xff] }
   0x2   :  { %10 = vst [vmem:[%s39_s1] sm:$0xff] %v8_v0 }
   0x3   :  { %11 = vst [vmem:[%s39_s1 + $0x8] sm:$0xff] %v9_v1 }

</bundles_post_ra>
